<compile_context>
chip_gen: v7x
topology: tpu7x:2x2x1
jax: 0.10.0
libtpu: 0.0.40
codegen_flags: <defaults>
</compile_context>

<pallas_src>
import functools

import jax
import jax.numpy as jnp
from jax import lax
from jax.experimental import pallas as pl
from jax.experimental.pallas import tpu as pltpu


def _round_up(n, m):
    return ((n + m - 1) // m) * m


def _cdiv(a, b):
    return -(-a // b)


def _const_spec(shape, index_map):
    # Constant-index operand (W, bias): request single buffering to save VMEM.
    try:
        return pl.BlockSpec(shape, index_map, pipeline_mode=pl.Buffered(1))
    except Exception:
        return pl.BlockSpec(shape, index_map)


def _linear_softmax_kernel(x_ref, w_ref, b_ref, out_ref, *, num_classes, use_bf16):
    xv = x_ref[...]
    if use_bf16:
        xv = xv.astype(jnp.bfloat16)
    # logits = x @ W^T + b   (f32 accumulation on the MXU)
    logits = jnp.dot(xv, w_ref[...], preferred_element_type=jnp.float32)
    logits = logits + b_ref[...]              # padded class lanes carry -1e30
    # numerically-stable softmax over the lane-dense padded class axis
    m = jnp.max(logits, axis=1, keepdims=True)
    e = jnp.exp(logits - m)                   # pad lanes underflow to 0
    denom = jnp.sum(e, axis=1, keepdims=True)
    inv = pl.reciprocal(denom)                # exact: only (TM, 1) elements
    # slim writeback: only the true C class columns are stored
    out_ref[...] = (e[:, :num_classes] * inv).astype(out_ref.dtype)


def _linear_ce_kernel(x_ref, w_ref, b_ref, y_ref, loss_ref, *,
                      total_rows, tiles_per_core, tile_m, use_bf16):
    c = pl.program_id(0)        # core (parallel) axis
    i = pl.program_id(1)        # per-core batch-tile (arbitrary/reduction) axis

    @pl.when(i == 0)
    def _init():
        loss_ref[...] = jnp.zeros_like(loss_ref)

    xv = x_ref[...]
    if use_bf16:
        xv = xv.astype(jnp.bfloat16)
    logits = jnp.dot(xv, w_ref[...], preferred_element_type=jnp.float32)
    logits = logits + b_ref[...]

    # log-sum-exp over padded class axis (pad lanes contribute exp() == 0)
    m = jnp.max(logits, axis=1, keepdims=True)
    shifted = logits - m
    lse = jnp.log(jnp.sum(jnp.exp(shifted), axis=1, keepdims=True))

    tm, cp = logits.shape
    classes = lax.broadcasted_iota(jnp.int32, (tm, cp), 1)
    # gather the label's shifted logit; no full (TM, C_pad) log_probs temp
    picked = jnp.sum(jnp.where(classes == y_ref[...], shifted, 0.0),
                     axis=1, keepdims=True)
    nll = lse - picked                                     # (tm, 1)

    # mask rows that fall past the true batch (partial / duplicated tiles)
    tile = c * tiles_per_core + i
    rows = tile * tile_m + lax.broadcasted_iota(jnp.int32, (tm, 1), 0)
    nll = jnp.where(rows < total_rows, nll, 0.0)

    # per-core partial sum, broadcast into this core's resident (1,8,128) slab
    loss_ref[...] = loss_ref[...] + jnp.sum(nll, axis=0, keepdims=True)


def torch_model_forward(x, weight, bias, y=None, *, tile_m=1024, use_bf16=True):
    """TorchModel.forward.

    x:      (batch, input_size) f32        (streamed unpadded from HBM)
    weight: (num_classes, input_size)      -- torch nn.Linear layout
    bias:   (num_classes,)
    y:      optional (batch,) integer labels
    """
    B, D = x.shape
    C = weight.shape[0]
    C_pad = _round_up(C, 128)
    cdt = jnp.bfloat16 if use_bf16 else jnp.float32

    # constant operands (tiny): class axis padded to a full 128-lane width
    w_t = jnp.zeros((D, C_pad), dtype=cdt).at[:, :C].set(weight.T.astype(cdt))
    # bias stays f32: padded class lanes get -1e30 so they vanish under softmax/lse
    b_row = jnp.full((1, C_pad), -1e30, dtype=jnp.float32).at[0, :C].set(
        bias.astype(jnp.float32))

    # generation-aware VMEM budget (~3/4 of physical, capped; safe fallback)
    try:
        phys = int(pltpu.get_tpu_info().vmem_capacity_bytes)
    except Exception:
        phys = 64 * 1024 * 1024
    vmem_limit = max(32 * 1024 * 1024, min(phys * 3 // 4, 112 * 1024 * 1024))

    # per-step VMEM model -> cap TM; then balance tiles across the grid
    x_bytes = jnp.dtype(x.dtype).itemsize
    w_bytes = jnp.dtype(cdt).itemsize
    fixed = 2 * D * C_pad * w_bytes + 2 * C_pad * 4
    per_row = 2 * D * x_bytes + 2 * D + 6 * C_pad * 4
    budget = int(vmem_limit * 0.8) - fixed
    if budget > per_row * 8:
        tm_cap = max(8, (budget // per_row) // 8 * 8)
    else:
        tm_cap = 8
    tm_cap = min(tile_m, tm_cap)

    n_tiles = _cdiv(B, tm_cap)
    TM = B if n_tiles <= 1 else min(_round_up(_cdiv(B, n_tiles), 8), B)
    grid_m = _cdiv(B, TM)

    if y is None:
        # ---- inference: softmax(Linear(x), dim=1) ----
        x_spec = pl.BlockSpec((TM, D), lambda i: (i, 0))
        w_spec = _const_spec((D, C_pad), lambda i: (0, 0))
        b_spec = _const_spec((1, C_pad), lambda i: (0, 0))
        out = pl.pallas_call(
            functools.partial(_linear_softmax_kernel,
                              num_classes=C, use_bf16=use_bf16),
            out_shape=jax.ShapeDtypeStruct((B, C), jnp.float32),
            grid=(grid_m,),
            in_specs=[x_spec, w_spec, b_spec],
            out_specs=pl.BlockSpec((TM, C), lambda i: (i, 0)),
            compiler_params=pltpu.CompilerParams(
                dimension_semantics=("parallel",),
                vmem_limit_bytes=vmem_limit),
        )(x, w_t, b_row)
        return out

    # ---- training: cross_entropy(Linear(x), y), mean reduction ----
    NC = 2 if grid_m >= 2 else 1            # split across TensorCores (v7x)
    T = _cdiv(grid_m, NC)                   # batch tiles per core
    last = grid_m - 1

    def row_map(c, i):
        # clamp so duplicated trailing tiles still read a valid block;
        # the in-kernel row mask zeroes their contribution.
        return (jnp.minimum(c * T + i, last), 0)

    y2 = y.reshape(-1, 1).astype(jnp.int32)  # equivalent of y.view(-1).long()

    x_spec = pl.BlockSpec((TM, D), row_map)
    y_spec = pl.BlockSpec((TM, 1), row_map)
    w_spec = _const_spec((D, C_pad), lambda c, i: (0, 0))
    b_spec = _const_spec((1, C_pad), lambda c, i: (0, 0))

    partials = pl.pallas_call(
        functools.partial(_linear_ce_kernel, total_rows=B,
                          tiles_per_core=T, tile_m=TM, use_bf16=use_bf16),
        out_shape=jax.ShapeDtypeStruct((NC, 8, 128), jnp.float32),
        grid=(NC, T),
        in_specs=[x_spec, w_spec, b_spec, y_spec],
        out_specs=pl.BlockSpec((1, 8, 128), lambda c, i: (c, 0, 0)),
        compiler_params=pltpu.CompilerParams(
            dimension_semantics=("parallel", "arbitrary"),
            vmem_limit_bytes=vmem_limit),
    )(x, w_t, b_row, y2)
    # finalize (sum per-core partials, mean reduction) in the wrapper
    return jnp.sum(partials[:, 0, 0]) / jnp.float32(B)


if __name__ == "__main__":
    input_size = 32
    num_classes = 5
    batch = 8

    key = jax.random.PRNGKey(0)
    kx, kw, kb, ky = jax.random.split(key, 4)

    x = jax.random.normal(kx, (batch, input_size), dtype=jnp.float32)
    # torch nn.Linear layout: weight (C, D), bias (C,)
    w = jax.random.normal(kw, (num_classes, input_size), dtype=jnp.float32) * 0.1
    b = jax.random.normal(kb, (num_classes,), dtype=jnp.float32) * 0.1
    y = jax.random.randint(ky, (batch,), 0, num_classes, dtype=jnp.int32)

    # inference path: softmax over classes
    probs = jax.block_until_ready(torch_model_forward(x, w, b))
    # training path: scalar cross-entropy loss
    loss = jax.block_until_ready(torch_model_forward(x, w, b, y=y))

    # plain-JAX reference (same bf16 rounding of the MXU inputs as the kernel)
    x_r = x.astype(jnp.bfloat16).astype(jnp.float32)
    w_r = w.astype(jnp.bfloat16).astype(jnp.float32)
    logits_ref = x_r @ w_r.T + b
    probs_ref = jax.nn.softmax(logits_ref, axis=1)
    logp_ref = jax.nn.log_softmax(logits_ref, axis=1)
    loss_ref = -jnp.mean(jnp.take_along_axis(logp_ref, y.reshape(-1, 1), axis=1))

    assert probs.shape == (batch, num_classes)
    assert jnp.allclose(probs, probs_ref, atol=5e-3), "softmax mismatch"
    assert jnp.allclose(jnp.sum(probs, axis=1), 1.0, atol=1e-4), "rows must sum to 1"
    assert jnp.allclose(loss, loss_ref, atol=5e-3), "loss mismatch"

    print("KERNEL_OK")
</pallas_src>

<mosaic_0001>
module attributes {stable_mosaic.version = 11 : i64} {
  func.func @_linear_softmax_kernel(%arg0: i32, %arg1: memref<8x32xf32, #tpu.memory_space<vmem>>, %arg2: memref<32x128xbf16, #tpu.memory_space<vmem>>, %arg3: memref<1x128xf32, #tpu.memory_space<vmem>>, %arg4: memref<8x5xf32, #tpu.memory_space<vmem>>) attributes {dimension_semantics = [#tpu.dimension_semantics<parallel>], iteration_bounds = array<i64: 1>, scalar_prefetch = 0 : i64, scratch_operands = 0 : i64, tpu.core_type = #tpu.core_type<tc>, window_params = [{transform_indices = @transform_0, window_bounds = array<i64: 8, 32>}, {pipeline_mode = #tpu.pipeline_mode<synchronous>, transform_indices = @transform_1, window_bounds = array<i64: 32, 128>}, {pipeline_mode = #tpu.pipeline_mode<synchronous>, transform_indices = @transform_2, window_bounds = array<i64: 1, 128>}, {transform_indices = @transform_3, window_bounds = array<i64: 8, 5>}]} {
    %c0 = arith.constant 0 : index
    %c0_0 = arith.constant 0 : index
    %0 = vector.load %arg1[%c0, %c0_0] : memref<8x32xf32, #tpu.memory_space<vmem>>, vector<8x32xf32>
    %1 = arith.truncf %0 : vector<8x32xf32> to vector<8x32xbf16>
    %c0_1 = arith.constant 0 : index
    %c0_2 = arith.constant 0 : index
    %2 = vector.load %arg2[%c0_1, %c0_2] : memref<32x128xbf16, #tpu.memory_space<vmem>>, vector<32x128xbf16>
    %cst = arith.constant dense<0.000000e+00> : vector<8x128xf32>
    %3 = tpu.matmul %1, %2, %cst {dimension_numbers = #tpu.dot_dimension_numbers<[1], [0], [0], [1], [0, 0, 1, 1], [], []>} : vector<8x32xbf16>, vector<32x128xbf16>, vector<8x128xf32> -> vector<8x128xf32>
    %c0_3 = arith.constant 0 : index
    %c0_4 = arith.constant 0 : index
    %4 = vector.load %arg3[%c0_3, %c0_4] : memref<1x128xf32, #tpu.memory_space<vmem>>, vector<1x128xf32>
    %5 = vector.broadcast %4 : vector<1x128xf32> to vector<8x128xf32>
    %6 = arith.addf %3, %5 : vector<8x128xf32>
    %cst_5 = arith.constant dense<0xFF800000> : vector<8xf32>
    %7 = vector.multi_reduction <maximumf>, %6, %cst_5 [1] : vector<8x128xf32> to vector<8xf32>
    %8 = vector.shape_cast %7 : vector<8xf32> to vector<8x1xf32>
    %9 = vector.broadcast %8 : vector<8x1xf32> to vector<8x128xf32>
    %10 = arith.subf %6, %9 : vector<8x128xf32>
    %11 = math.exp %10 : vector<8x128xf32>
    %cst_6 = arith.constant dense<0.000000e+00> : vector<8xf32>
    %12 = vector.multi_reduction <add>, %11, %cst_6 [1] : vector<8x128xf32> to vector<8xf32>
    %13 = vector.shape_cast %12 : vector<8xf32> to vector<8x1xf32>
    %14 = tpu.reciprocal %13 : vector<8x1xf32> -> vector<8x1xf32>
    %15 = vector.extract_strided_slice %11 {offsets = [0, 0], sizes = [8, 5], strides = [1, 1]} : vector<8x128xf32> to vector<8x5xf32>
    %16 = vector.broadcast %14 : vector<8x1xf32> to vector<8x5xf32>
    %17 = arith.mulf %15, %16 : vector<8x5xf32>
    %c0_7 = arith.constant 0 : index
    %c0_8 = arith.constant 0 : index
    %18 = vector.load %arg4[%c0_7, %c0_8] : memref<8x5xf32, #tpu.memory_space<vmem>>, vector<8x5xf32>
    tpu.vector_store %arg4[%c0_7, %c0_8], %17 {strides = array<i32>} : memref<8x5xf32, #tpu.memory_space<vmem>>, vector<8x5xf32>,
    return
  }
  func.func @transform_0(%arg0: i32) -> (i32, i32) {
    %c0_i32 = arith.constant 0 : i32
    %c0_i32_0 = arith.constant 0 : i32
    return %arg0, %c0_i32 : i32, i32
  }
  func.func @transform_1(%arg0: i32) -> (i32, i32) {
    %c0_i32 = arith.constant 0 : i32
    %c0_i32_0 = arith.constant 0 : i32
    %c0_i32_1 = arith.constant 0 : i32
    return %c0_i32, %c0_i32_0 : i32, i32
  }
  func.func @transform_2(%arg0: i32) -> (i32, i32) {
    %c0_i32 = arith.constant 0 : i32
    %c0_i32_0 = arith.constant 0 : i32
    %c0_i32_1 = arith.constant 0 : i32
    return %c0_i32, %c0_i32_0 : i32, i32
  }
  func.func @transform_3(%arg0: i32) -> (i32, i32) {
    %c0_i32 = arith.constant 0 : i32
    %c0_i32_0 = arith.constant 0 : i32
    return %arg0, %c0_i32 : i32, i32
  }
}

</mosaic_0001>

<bundles_post_ra>
// kernel: tpu_custom_call.1
= control target key start
LH: loop header
LB: loop body
LE: loop exit
PB: predicated region body
PF: predicated region fallthrough
CT: control target
= control target key end

     0   :  { %8 = vsyncpa [#allocation3], 0  ;;  %s311_s0 = inlined_call_operand.hbm [shape: f32[8,32], index: 0, kind: input, shape index: {}]   ;;  %s312_s1 = inlined_call_operand.hbm [shape: bf16[32,128], index: 1, kind: input, shape index: {}]   ;;  %s313_s2 = inlined_call_operand.vmem [shape: f32[1,128], index: 2, kind: input, shape index: {}]   ;;  %s314_s3 = inlined_call_operand.hbm [shape: f32[8,5], index: 3, kind: output, shape index: {}]  }
   0x1   :  { %9 = vsyncpa [#allocation6], 0 }
   0x2   :  { %10 = vsyncpa [#allocation4], 0  ;;  %s238_s12 = smov [#allocation2]   ;;  %s239_s14 = smov [#allocation5]  }
   0x3   :  { %s17_s13 = sshll.u32 %s238_s12, 4  ;;  %s26_s15 = sshll.u32 %s239_s14, 4  ;;  %s18_s13 = int_to_ptr.vmem [resolvable:$true] %s17_s13  ;;  %s265_s15 = int_to_ptr.vmem [resolvable:$true] %s26_s15 }
   0x4   :  { %s166_s18 = scalar_lea.hbm %s311_s0, 128 }
   0x5   :  { %p167_p0 = scmp.ne.s32.totalorder %s311_s0, %s166_s18  ;;  %p170_p1 = scmp.lt.u32.totalorder %s166_s18, %s311_s0 }
   0x7   :  { %p172_p2 = pnand %p170_p1, %p167_p0 }
   0x9   :  { %175 = shalt.err (!%p172_p2)
}
   0xa   :  { %s176_s23 = scalar_lea.vmem %s18_s13, 128  ;;  %p181_p4 = scmp.lt.s32.totalorder %s18_s13, %s18_s13 }
   0xb   :  { %p177_p3 = scmp.ne.s32.totalorder %s18_s13, %s176_s23  ;;  %p182_p5 = scmp.lt.s32.totalorder %s176_s23, %s176_s23 }
   0xd   :  { %p183_p6 = por %p182_p5, %p181_p4 }
   0xf   :  { %p184_p7 = pnand %p183_p6, %p177_p3 }
  0x11   :  { %187 = shalt.err (!%p184_p7)
}
  0x12   :  { %20 = dma.hbm_to_vmem [thread:$0]  %s311_s0, 128, %s18_s13, [#allocation3]  }
  0x13   :  { %s188_s28 = scalar_lea.hbm %s312_s1, 256 }
  0x14   :  { %p189_p8 = scmp.ne.s32.totalorder %s312_s1, %s188_s28  ;;  %p192_p9 = scmp.lt.u32.totalorder %s188_s28, %s312_s1 }
  0x16   :  { %p194_p10 = pnand %p192_p9, %p189_p8 }
  0x18   :  { %197 = shalt.err (!%p194_p10)
}
  0x19   :  { %s198_s6 = scalar_lea.vmem %s265_s15, 256  ;;  %p203_p12 = scmp.lt.s32.totalorder %s265_s15, %s265_s15 }
  0x1a   :  { %p199_p11 = scmp.ne.s32.totalorder %s265_s15, %s198_s6  ;;  %p204_p13 = scmp.lt.s32.totalorder %s198_s6, %s198_s6 }
  0x1c   :  { %p205_p0 = por %p204_p13, %p203_p12 }
  0x1e   :  { %p206_p1 = pnand %p205_p0, %p199_p11 }
  0x20   :  { %209 = shalt.err (!%p206_p1)
}
  0x21   :  { %s240_s0 = smov 64   ;;  %s241_s7 = smov 4  }
  0x22   :  { %32 = dma.hbm_to_vmem [thread:$0]  %s312_s1, 256, %s265_s15, [#allocation6], %s240_s0, %s240_s0, %s241_s7  }
  0x23   :  { %232 = dma.done.wait [#allocation3], 128  }
  0x24   :  { %233 = vsyncadd [#allocation3], 4294967168 }
  0x25   :  { %234 = dma.done.wait [#allocation6], 256  }
  0x26   :  { %235 = vsyncadd [#allocation6], 4294967040  ;;  %v242_v0 = vmov 0.0   ;;  %vm243_vm0 = vmmov 0   ;;  %v160_v1 = vld [vmem:[#allocation5] sm:$0xff]   ;;  %v161_v2 = vld [vmem:[#allocation5 + $0x8] sm:$0xff]  }
  0x27   :  { %145 = vmatprep.subr.bf16.mxu0 %v242_v0  ;;  %149 = vmatprep.mubr.msk.bf16.mxu0 %vm243_vm0, %v242_v0  ;;  %v42_v3 = vld [vmem:[#allocation2] sm:$0xff]  ;;  %vm67_vm1 = vcmask 261120   ;;  %s244_s1 = smov [#allocation7]   ;;  %vm120_vm2 = vcmask 39936  }
  0x28   :  { %146 = vmatpush3.bf16.msra.mxu0 %v160_v1  ;;  %v43_v4 = vpack.c.bf16 %v42_v3, %v42_v3  ;;  %v138_v5 = vld [vmem:[%s313_s2] ss:$0 sm:$0xff]  ;;  %s128_s12 = sshll.u32 %s244_s1, 4  ;;  %s129_s12 = int_to_ptr.vmem [resolvable:$true] %s128_s12 }
  0x29   :  { %147 = vmatprep.subr.bf16.mxu0 %v242_v0  ;;  %s210_s2 = scalar_lea.vmem %s129_s12, 128  ;;  %p215_p3 = scmp.lt.s32.totalorder %s129_s12, %s129_s12 }
  0x2a   :  { %p211_p2 = scmp.ne.s32.totalorder %s129_s12, %s210_s2  ;;  %p216_p4 = scmp.lt.s32.totalorder %s210_s2, %s210_s2 }
  0x2c   :  { %148 = vmatpush3.bf16.msra.mxu0 %v161_v2  ;;  %p217_p5 = por %p216_p4, %p215_p3 }
  0x2e   :  { %p218_p6 = pnand %p217_p5, %p211_p2 }
  0x2f   :  { %150 = vmatmul.mubr.msk.bf16.vlgmr.msra.gmra.mrb[0].mxu0 %vm67_vm1, %v43_v4 }
 0x102   :  { %v105_v6 = vpop.f32.mrb[0].mxu0 }
 0x103   :  { %v106_v7 = vadd.f32 %v138_v5, %v105_v6  ;;  %v151_v8 = vpop.f32.mrb[1].mxu0 }
 0x104   :  { %v108_v9 = vpop.f32.mrb[2].mxu0 }
 0x105   :  { %111 = vmax.xlane.f32.xlu0 %v106_v7  ;;  %v152_v10 = vpop.f32.mrb[3].mxu0 }
 0x192   :  { %v112_v11 = vpop.xlane.xlu0 %111 }
 0x193   :  { %v113_v12 = vsub.f32 %v106_v7, %v112_v11 }
 0x195   :  { %v114_v13 = vmul.f32 1.442695, %v113_v12 }
 0x197   :  { %162 = vpow2.f32 %v114_v13 }
 0x1a1   :  { %v163_v14 = vpop.eup %162 }
 0x1a2   :  { %116 = vadd.xlane.f32.xlu0 %v163_v14 }
 0x22f   :  { %v117_v15 = vpop.xlane.xlu0 %116 }
 0x230   :  { %164 = vrcp.f32 %v117_v15 }
 0x23a   :  { %v165_v16 = vpop.eup %164 }
 0x23b   :  { %v119_v17 = vmul.f32 %v165_v16, %v163_v14 }
 0x23d   :  { %121 = vst.msk [vmem:[#allocation7] sm:$0xff] %vm120_vm2, %v119_v17 }
 0x23e   :  { %221 = shalt.err (!%p218_p6)
}
 0x23f   :  { %s222_s15 = scalar_lea.hbm %s314_s3, 128 }
 0x240   :  { %p223_p7 = scmp.ne.s32.totalorder %s314_s3, %s222_s15  ;;  %p226_p8 = scmp.lt.u32.totalorder %s222_s15, %s314_s3 }
 0x242   :  { %p228_p9 = pnand %p226_p8, %p223_p7 }
 0x244   :  { %231 = shalt.err (!%p228_p9)
}
 0x245   :  { %131 = dma.vmem_to_hbm [thread:$0]  %s129_s12, 128, %s314_s3, [#allocation4]  }
 0x246   :  { %236 = dma.done.wait [#allocation4], 128  }
 0x247   :  { %237 = vsyncadd [#allocation4], 4294967168 }
 0x248   :  { %135 = vsyncpa [#allocation3], 1 }
 0x249   :  { %136 = vsyncpa [#allocation6], 1 }
 0x24a   :  { %137 = vsyncpa [#allocation4], 1 }

</bundles_post_ra>
